<compile_context>
chip_gen: v7x
topology: tpu7x:2x2x1
jax: 0.10.0
libtpu: 0.0.40
codegen_flags: <defaults>
</compile_context>

<pallas_src>
import jax
import jax.numpy as jnp
from jax.experimental import pallas as pl
from jax.experimental.pallas import tpu as pltpu

HIDDEN_SIZE = 96   # logical hidden width (matches the PyTorch module)
H_PAD = 128        # lane-dense padded hidden width
LANE = 128
SUBLANE = 8


def _round_up(n, m):
    return (n + m - 1) // m * m


def mlp_kernel(x_ref, w_in_ref, b_in_ref, w_ref, b_ref, w_out_ref, b_out_ref, o_ref):
    # x / weights are bf16; MXU accumulates in f32; bias-add + ReLU stay in f32.
    h = jnp.dot(x_ref[...], w_in_ref[...],
                preferred_element_type=jnp.float32) + b_in_ref[...]
    h = jnp.maximum(h, 0.0)

    # fc + ReLU applied twice with SHARED weights, same as the PyTorch module.
    h = jnp.dot(h.astype(jnp.bfloat16), w_ref[...],
                preferred_element_type=jnp.float32) + b_ref[...]
    h = jnp.maximum(h, 0.0)
    h = jnp.dot(h.astype(jnp.bfloat16), w_ref[...],
                preferred_element_type=jnp.float32) + b_ref[...]
    h = jnp.maximum(h, 0.0)

    # fc_out (no activation); full-width (128-lane) f32 store -> unmasked vst.
    out = jnp.dot(h.astype(jnp.bfloat16), w_out_ref[...],
                  preferred_element_type=jnp.float32) + b_out_ref[...]
    o_ref[...] = out.astype(o_ref.dtype)


def _choose_batch_tile(batch):
    """Small batches: one grid step (minimal pipeline overhead, whole problem is
    VMEM-resident). Large batches: 512-row tiles so the grid pipelines and can
    be split across v7x TensorCores ("parallel" axis)."""
    b_pad = _round_up(batch, SUBLANE)
    if b_pad <= 1024:
        return b_pad, b_pad
    tb = 512
    return _round_up(b_pad, tb), tb


def mlp_forward(x, params):
    """x: (B, D_in) float32. params: f32 dict, weights laid out (in, out), biases (1, out)."""
    B, D_in = x.shape
    H = HIDDEN_SIZE
    D_pad = _round_up(D_in, LANE)
    B_pad, tb = _choose_batch_tile(B)
    grid = (B_pad // tb,)

    # ---- wrapper-side layout plumbing: zero-pad to lane-dense shapes, bf16 cast ----
    x_p = jnp.zeros((B_pad, D_pad), jnp.bfloat16).at[:B, :D_in].set(x.astype(jnp.bfloat16))

    def pad_w(w, rows, cols):
        return (jnp.zeros((rows, cols), jnp.bfloat16)
                .at[: w.shape[0], : w.shape[1]].set(w.astype(jnp.bfloat16)))

    def pad_b(b):
        b = b.reshape(1, -1).astype(jnp.float32)
        return jnp.zeros((1, H_PAD), jnp.float32).at[:, : b.shape[1]].set(b)

    w_in = pad_w(params["w_in"], D_pad, H_PAD)
    w = pad_w(params["w"], H_PAD, H_PAD)
    w_out = pad_w(params["w_out"], H_PAD, H_PAD)
    b_in, b, b_out = pad_b(params["b_in"]), pad_b(params["b"]), pad_b(params["b_out"])

    # Constant-index BlockSpecs -> weights/biases stay resident in VMEM across the grid.
    full = lambda shape: pl.BlockSpec(shape, lambda i: (0, 0))

    flops = 2 * B_pad * (D_pad * H_PAD + 3 * H_PAD * H_PAD)
    bytes_accessed = (x_p.size * 2                      # bf16 input
                      + B_pad * H_PAD * 4               # f32 output
                      + (w_in.size + w.size + w_out.size) * 2
                      + 3 * H_PAD * 4)                  # biases

    out_pad = pl.pallas_call(
        mlp_kernel,
        out_shape=jax.ShapeDtypeStruct((B_pad, H_PAD), jnp.float32),
        grid_spec=pltpu.PrefetchScalarGridSpec(
            num_scalar_prefetch=0,
            grid=grid,
            in_specs=[
                pl.BlockSpec((tb, D_pad), lambda i: (i, 0)),   # x tile
                full((D_pad, H_PAD)),                          # W_in
                full((1, H_PAD)),                              # b_in
                full((H_PAD, H_PAD)),                          # W (shared layer)
                full((1, H_PAD)),                              # b
                full((H_PAD, H_PAD)),                          # W_out
                full((1, H_PAD)),                              # b_out
            ],
            out_specs=pl.BlockSpec((tb, H_PAD), lambda i: (i, 0)),
        ),
        compiler_params=pltpu.CompilerParams(dimension_semantics=("parallel",)),
        cost_estimate=pl.CostEstimate(
            flops=flops, transcendentals=0, bytes_accessed=bytes_accessed),
    )(x_p, w_in, b_in, w, b, w_out, b_out)

    # Slice padded rows/lanes back to the logical (B, 96) result.
    return out_pad[:B, :H]


def init_params(key, input_size):
    """Deterministic init matching PyTorch nn.Linear's U(-1/sqrt(fan_in), 1/sqrt(fan_in)).
    Weights are stored pre-transposed as (in_features, out_features)."""
    H = HIDDEN_SIZE
    ks = jax.random.split(key, 6)

    def linear(kw, kb, fan_in, fan_out):
        bound = 1.0 / jnp.sqrt(fan_in)
        w = jax.random.uniform(kw, (fan_in, fan_out), jnp.float32, -bound, bound)
        b = jax.random.uniform(kb, (1, fan_out), jnp.float32, -bound, bound)
        return w, b

    w_in, b_in = linear(ks[0], ks[1], input_size, H)
    w, b = linear(ks[2], ks[3], H, H)
    w_out, b_out = linear(ks[4], ks[5], H, H)
    return {"w_in": w_in, "b_in": b_in, "w": w, "b": b, "w_out": w_out, "b_out": b_out}


def mlp_reference(x, p):
    """Mirrors the kernel arithmetic: bf16 matmul operands, f32 accumulation."""
    def mm(a, w):
        return jnp.dot(a.astype(jnp.bfloat16), w.astype(jnp.bfloat16),
                       preferred_element_type=jnp.float32)
    h = jnp.maximum(mm(x, p["w_in"]) + p["b_in"], 0.0)
    h = jnp.maximum(mm(h, p["w"]) + p["b"], 0.0)
    h = jnp.maximum(mm(h, p["w"]) + p["b"], 0.0)
    return mm(h, p["w_out"]) + p["b_out"]


if __name__ == "__main__":
    key = jax.random.PRNGKey(0)
    k_x, k_p = jax.random.split(key)

    B, D_in = 32, 16
    x = jax.random.normal(k_x, (B, D_in), dtype=jnp.float32)
    params = init_params(k_p, D_in)

    out = mlp_forward(x, params)
    out = jax.block_until_ready(out)

    ref = mlp_reference(x, params)
    assert out.shape == (B, HIDDEN_SIZE), out.shape
    assert jnp.allclose(out, ref, atol=1e-3, rtol=1e-3), "mismatch vs JAX reference"

    print("KERNEL_OK")
</pallas_src>

<mosaic_0001>
module attributes {stable_mosaic.version = 11 : i64} {
  func.func @mlp_kernel(%arg0: i32, %arg1: memref<32x128xbf16, #tpu.memory_space<vmem>>, %arg2: memref<128x128xbf16, #tpu.memory_space<vmem>>, %arg3: memref<1x128xf32, #tpu.memory_space<vmem>>, %arg4: memref<128x128xbf16, #tpu.memory_space<vmem>>, %arg5: memref<1x128xf32, #tpu.memory_space<vmem>>, %arg6: memref<128x128xbf16, #tpu.memory_space<vmem>>, %arg7: memref<1x128xf32, #tpu.memory_space<vmem>>, %arg8: memref<32x128xf32, #tpu.memory_space<vmem>>) attributes {dimension_semantics = [#tpu.dimension_semantics<parallel>], iteration_bounds = array<i64: 1>, scalar_prefetch = 0 : i64, scratch_operands = 0 : i64, tpu.core_type = #tpu.core_type<tc>, window_params = [{transform_indices = @transform_0, window_bounds = array<i64: 32, 128>}, {pipeline_mode = #tpu.pipeline_mode<synchronous>, transform_indices = @transform_1, window_bounds = array<i64: 128, 128>}, {pipeline_mode = #tpu.pipeline_mode<synchronous>, transform_indices = @transform_2, window_bounds = array<i64: 1, 128>}, {pipeline_mode = #tpu.pipeline_mode<synchronous>, transform_indices = @transform_3, window_bounds = array<i64: 128, 128>}, {pipeline_mode = #tpu.pipeline_mode<synchronous>, transform_indices = @transform_4, window_bounds = array<i64: 1, 128>}, {pipeline_mode = #tpu.pipeline_mode<synchronous>, transform_indices = @transform_5, window_bounds = array<i64: 128, 128>}, {pipeline_mode = #tpu.pipeline_mode<synchronous>, transform_indices = @transform_6, window_bounds = array<i64: 1, 128>}, {transform_indices = @transform_7, window_bounds = array<i64: 32, 128>}]} {
    %c0 = arith.constant 0 : index
    %c0_0 = arith.constant 0 : index
    %0 = vector.load %arg1[%c0, %c0_0] : memref<32x128xbf16, #tpu.memory_space<vmem>>, vector<32x128xbf16>
    %c0_1 = arith.constant 0 : index
    %c0_2 = arith.constant 0 : index
    %1 = vector.load %arg2[%c0_1, %c0_2] : memref<128x128xbf16, #tpu.memory_space<vmem>>, vector<128x128xbf16>
    %cst = arith.constant dense<0.000000e+00> : vector<32x128xf32>
    %2 = tpu.matmul %0, %1, %cst {dimension_numbers = #tpu.dot_dimension_numbers<[1], [0], [0], [1], [0, 0, 1, 1], [], []>} : vector<32x128xbf16>, vector<128x128xbf16>, vector<32x128xf32> -> vector<32x128xf32>
    %c0_3 = arith.constant 0 : index
    %c0_4 = arith.constant 0 : index
    %3 = vector.load %arg3[%c0_3, %c0_4] : memref<1x128xf32, #tpu.memory_space<vmem>>, vector<1x128xf32>
    %4 = vector.broadcast %3 : vector<1x128xf32> to vector<32x128xf32>
    %5 = arith.addf %2, %4 : vector<32x128xf32>
    %cst_5 = arith.constant 0.000000e+00 : f32
    %6 = vector.broadcast %cst_5 : f32 to vector<32x128xf32>
    %7 = arith.maximumf %5, %6 : vector<32x128xf32>
    %8 = arith.truncf %7 : vector<32x128xf32> to vector<32x128xbf16>
    %c0_6 = arith.constant 0 : index
    %c0_7 = arith.constant 0 : index
    %9 = vector.load %arg4[%c0_6, %c0_7] : memref<128x128xbf16, #tpu.memory_space<vmem>>, vector<128x128xbf16>
    %cst_8 = arith.constant dense<0.000000e+00> : vector<32x128xf32>
    %10 = tpu.matmul %8, %9, %cst_8 {dimension_numbers = #tpu.dot_dimension_numbers<[1], [0], [0], [1], [0, 0, 1, 1], [], []>} : vector<32x128xbf16>, vector<128x128xbf16>, vector<32x128xf32> -> vector<32x128xf32>
    %c0_9 = arith.constant 0 : index
    %c0_10 = arith.constant 0 : index
    %11 = vector.load %arg5[%c0_9, %c0_10] : memref<1x128xf32, #tpu.memory_space<vmem>>, vector<1x128xf32>
    %12 = vector.broadcast %11 : vector<1x128xf32> to vector<32x128xf32>
    %13 = arith.addf %10, %12 : vector<32x128xf32>
    %cst_11 = arith.constant 0.000000e+00 : f32
    %14 = vector.broadcast %cst_11 : f32 to vector<32x128xf32>
    %15 = arith.maximumf %13, %14 : vector<32x128xf32>
    %16 = arith.truncf %15 : vector<32x128xf32> to vector<32x128xbf16>
    %c0_12 = arith.constant 0 : index
    %c0_13 = arith.constant 0 : index
    %17 = vector.load %arg4[%c0_12, %c0_13] : memref<128x128xbf16, #tpu.memory_space<vmem>>, vector<128x128xbf16>
    %cst_14 = arith.constant dense<0.000000e+00> : vector<32x128xf32>
    %18 = tpu.matmul %16, %17, %cst_14 {dimension_numbers = #tpu.dot_dimension_numbers<[1], [0], [0], [1], [0, 0, 1, 1], [], []>} : vector<32x128xbf16>, vector<128x128xbf16>, vector<32x128xf32> -> vector<32x128xf32>
    %c0_15 = arith.constant 0 : index
    %c0_16 = arith.constant 0 : index
    %19 = vector.load %arg5[%c0_15, %c0_16] : memref<1x128xf32, #tpu.memory_space<vmem>>, vector<1x128xf32>
    %20 = vector.broadcast %19 : vector<1x128xf32> to vector<32x128xf32>
    %21 = arith.addf %18, %20 : vector<32x128xf32>
    %cst_17 = arith.constant 0.000000e+00 : f32
    %22 = vector.broadcast %cst_17 : f32 to vector<32x128xf32>
    %23 = arith.maximumf %21, %22 : vector<32x128xf32>
    %24 = arith.truncf %23 : vector<32x128xf32> to vector<32x128xbf16>
    %c0_18 = arith.constant 0 : index
    %c0_19 = arith.constant 0 : index
    %25 = vector.load %arg6[%c0_18, %c0_19] : memref<128x128xbf16, #tpu.memory_space<vmem>>, vector<128x128xbf16>
    %cst_20 = arith.constant dense<0.000000e+00> : vector<32x128xf32>
    %26 = tpu.matmul %24, %25, %cst_20 {dimension_numbers = #tpu.dot_dimension_numbers<[1], [0], [0], [1], [0, 0, 1, 1], [], []>} : vector<32x128xbf16>, vector<128x128xbf16>, vector<32x128xf32> -> vector<32x128xf32>
    %c0_21 = arith.constant 0 : index
    %c0_22 = arith.constant 0 : index
    %27 = vector.load %arg7[%c0_21, %c0_22] : memref<1x128xf32, #tpu.memory_space<vmem>>, vector<1x128xf32>
    %28 = vector.broadcast %27 : vector<1x128xf32> to vector<32x128xf32>
    %29 = arith.addf %26, %28 : vector<32x128xf32>
    %c0_23 = arith.constant 0 : index
    %c0_24 = arith.constant 0 : index
    %30 = vector.load %arg8[%c0_23, %c0_24] : memref<32x128xf32, #tpu.memory_space<vmem>>, vector<32x128xf32>
    tpu.vector_store %arg8[%c0_23, %c0_24], %29 {strides = array<i32>} : memref<32x128xf32, #tpu.memory_space<vmem>>, vector<32x128xf32>,
    return
  }
  func.func @transform_0(%arg0: i32) -> (i32, i32) {
    %c0_i32 = arith.constant 0 : i32
    %c0_i32_0 = arith.constant 0 : i32
    return %arg0, %c0_i32 : i32, i32
  }
  func.func @transform_1(%arg0: i32) -> (i32, i32) {
    %c0_i32 = arith.constant 0 : i32
    %c0_i32_0 = arith.constant 0 : i32
    %c0_i32_1 = arith.constant 0 : i32
    return %c0_i32, %c0_i32_0 : i32, i32
  }
  func.func @transform_2(%arg0: i32) -> (i32, i32) {
    %c0_i32 = arith.constant 0 : i32
    %c0_i32_0 = arith.constant 0 : i32
    %c0_i32_1 = arith.constant 0 : i32
    return %c0_i32, %c0_i32_0 : i32, i32
  }
  func.func @transform_3(%arg0: i32) -> (i32, i32) {
    %c0_i32 = arith.constant 0 : i32
    %c0_i32_0 = arith.constant 0 : i32
    %c0_i32_1 = arith.constant 0 : i32
    return %c0_i32, %c0_i32_0 : i32, i32
  }
  func.func @transform_4(%arg0: i32) -> (i32, i32) {
    %c0_i32 = arith.constant 0 : i32
    %c0_i32_0 = arith.constant 0 : i32
    %c0_i32_1 = arith.constant 0 : i32
    return %c0_i32, %c0_i32_0 : i32, i32
  }
  func.func @transform_5(%arg0: i32) -> (i32, i32) {
    %c0_i32 = arith.constant 0 : i32
    %c0_i32_0 = arith.constant 0 : i32
    %c0_i32_1 = arith.constant 0 : i32
    return %c0_i32, %c0_i32_0 : i32, i32
  }
  func.func @transform_6(%arg0: i32) -> (i32, i32) {
    %c0_i32 = arith.constant 0 : i32
    %c0_i32_0 = arith.constant 0 : i32
    %c0_i32_1 = arith.constant 0 : i32
    return %c0_i32, %c0_i32_0 : i32, i32
  }
  func.func @transform_7(%arg0: i32) -> (i32, i32) {
    %c0_i32 = arith.constant 0 : i32
    %c0_i32_0 = arith.constant 0 : i32
    return %arg0, %c0_i32 : i32, i32
  }
}

</mosaic_0001>

<bundles_post_ra>
// kernel: tpu_custom_call.1
= control target key start
LH: loop header
LB: loop body
LE: loop exit
PB: predicated region body
PF: predicated region fallthrough
CT: control target
= control target key end

     0   :  { %12 = vsyncpa [#allocation3], 0  ;;  %s995_s0 = inlined_call_operand.hbm [shape: bf16[32,128], index: 0, kind: input, shape index: {}]   ;;  %s996_s1 = inlined_call_operand.hbm [shape: bf16[128,128], index: 1, kind: input, shape index: {}]   ;;  %s997_s2 = inlined_call_operand.vmem [shape: f32[1,128], index: 2, kind: input, shape index: {}]   ;;  %s998_s3 = inlined_call_operand.hbm [shape: bf16[128,128], index: 3, kind: input, shape index: {}]   ;;  %s999_s4 = inlined_call_operand.vmem [shape: f32[1,128], index: 4, kind: input, shape index: {}]   ;;  %s1000_s5 = inlined_call_operand.hbm [shape: bf16[128,128], index: 5, kind: input, shape index: {}]   ;;  %s1001_s6 = inlined_call_operand.vmem [shape: f32[1,128], index: 6, kind: input, shape index: {}]   ;;  %s1002_s7 = inlined_call_operand.hbm [shape: f32[32,128], index: 7, kind: output, shape index: {}]  }
   0x1   :  { %13 = vsyncpa [#allocation6], 0 }
   0x2   :  { %14 = vsyncpa [#allocation9], 0 }
   0x3   :  { %15 = vsyncpa [#allocation4], 0  ;;  %s851_s24 = smov [#allocation5]   ;;  %s852_s26 = smov [#allocation2]  }
   0x4   :  { %s33_s25 = sshll.u32 %s851_s24, 4  ;;  %s21_s27 = sshll.u32 %s852_s26, 4  ;;  %s34_s25 = int_to_ptr.vmem [resolvable:$true] %s33_s25  ;;  %s900_s27 = int_to_ptr.vmem [resolvable:$true] %s21_s27 }
   0x5   :  { %s733_s30 = scalar_lea.hbm %s996_s1, 1024 }
   0x6   :  { %p734_p0 = scmp.ne.s32.totalorder %s996_s1, %s733_s30  ;;  %p737_p1 = scmp.lt.u32.totalorder %s733_s30, %s996_s1 }
   0x8   :  { %p739_p2 = pnand %p737_p1, %p734_p0 }
   0xa   :  { %742 = shalt.err (!%p739_p2)
}
   0xb   :  { %s743_s12 = scalar_lea.vmem %s34_s25, 1024  ;;  %p748_p4 = scmp.lt.s32.totalorder %s34_s25, %s34_s25 }
   0xc   :  { %p744_p3 = scmp.ne.s32.totalorder %s34_s25, %s743_s12  ;;  %p749_p5 = scmp.lt.s32.totalorder %s743_s12, %s743_s12 }
   0xe   :  { %p750_p6 = por %p749_p5, %p748_p4 }
  0x10   :  { %p751_p7 = pnand %p750_p6, %p744_p3 }
  0x12   :  { %754 = shalt.err (!%p751_p7)
}
  0x13   :  { %s853_s13 = smov 64   ;;  %s854_s14 = smov 4  }
  0x14   :  { %39 = dma.hbm_to_vmem [thread:$0]  %s996_s1, 1024, %s34_s25, [#allocation6], %s853_s13, %s853_s13, %s854_s14  }
  0x15   :  { %s755_s19 = scalar_lea.hbm %s995_s0, 256 }
  0x16   :  { %p756_p8 = scmp.ne.s32.totalorder %s995_s0, %s755_s19  ;;  %p759_p9 = scmp.lt.u32.totalorder %s755_s19, %s995_s0 }
  0x18   :  { %p761_p10 = pnand %p759_p9, %p756_p8 }
  0x1a   :  { %764 = shalt.err (!%p761_p10)
}
  0x1b   :  { %s765_s24 = scalar_lea.vmem %s900_s27, 256  ;;  %p770_p12 = scmp.lt.s32.totalorder %s900_s27, %s900_s27 }
  0x1c   :  { %p766_p11 = scmp.ne.s32.totalorder %s900_s27, %s765_s24  ;;  %p771_p13 = scmp.lt.s32.totalorder %s765_s24, %s765_s24 }
  0x1e   :  { %p772_p0 = por %p771_p13, %p770_p12 }
  0x20   :  { %p773_p1 = pnand %p772_p0, %p766_p11 }
  0x22   :  { %776 = shalt.err (!%p773_p1)
}
  0x23   :  { %27 = dma.hbm_to_vmem [thread:$0]  %s995_s0, 256, %s900_s27, [#allocation3], %s853_s13, %s853_s13, %s854_s14  }
  0x24   :  { %s855_s26 = smov [#allocation7]   ;;  %s856_s29 = smov [#allocation8]  }
  0x25   :  { %s47_s28 = sshll.u32 %s855_s26, 4  ;;  %s61_s30 = sshll.u32 %s856_s29, 4  ;;  %s48_s28 = int_to_ptr.vmem [resolvable:$true] %s47_s28  ;;  %s937_s30 = int_to_ptr.vmem [resolvable:$true] %s61_s30 }
  0x26   :  { %s777_s10 = scalar_lea.hbm %s998_s3, 1024 }
  0x27   :  { %p778_p2 = scmp.ne.s32.totalorder %s998_s3, %s777_s10  ;;  %p781_p3 = scmp.lt.u32.totalorder %s777_s10, %s998_s3 }
  0x29   :  { %p783_p4 = pnand %p781_p3, %p778_p2 }
  0x2b   :  { %786 = shalt.err (!%p783_p4)
}
  0x2c   :  { %s787_s0 = scalar_lea.vmem %s48_s28, 1024  ;;  %p792_p6 = scmp.lt.s32.totalorder %s48_s28, %s48_s28 }
  0x2d   :  { %p788_p5 = scmp.ne.s32.totalorder %s48_s28, %s787_s0  ;;  %p793_p7 = scmp.lt.s32.totalorder %s787_s0, %s787_s0 }
  0x2f   :  { %p794_p8 = por %p793_p7, %p792_p6 }
  0x31   :  { %p795_p9 = pnand %p794_p8, %p788_p5 }
  0x33   :  { %798 = shalt.err (!%p795_p9)
}
  0x34   :  { %53 = dma.hbm_to_vmem [thread:$0]  %s998_s3, 1024, %s48_s28, [#allocation6], %s853_s13, %s853_s13, %s854_s14  }
  0x35   :  { %s799_s20 = scalar_lea.hbm %s1000_s5, 1024 }
  0x36   :  { %p800_p10 = scmp.ne.s32.totalorder %s1000_s5, %s799_s20  ;;  %p803_p11 = scmp.lt.u32.totalorder %s799_s20, %s1000_s5 }
  0x38   :  { %p805_p12 = pnand %p803_p11, %p800_p10 }
  0x3a   :  { %808 = shalt.err (!%p805_p12)
}
  0x3b   :  { %s809_s1 = scalar_lea.vmem %s937_s30, 1024  ;;  %p814_p0 = scmp.lt.s32.totalorder %s937_s30, %s937_s30 }
  0x3c   :  { %p810_p13 = scmp.ne.s32.totalorder %s937_s30, %s809_s1  ;;  %p815_p1 = scmp.lt.s32.totalorder %s809_s1, %s809_s1 }
  0x3e   :  { %p816_p2 = por %p815_p1, %p814_p0 }
  0x40   :  { %p817_p3 = pnand %p816_p2, %p810_p13 }
  0x42   :  { %820 = shalt.err (!%p817_p3)
}
  0x43   :  { %67 = dma.hbm_to_vmem [thread:$0]  %s1000_s5, 1024, %s937_s30, [#allocation9], %s853_s13, %s853_s13, %s854_s14  }
  0x44   :  { %843 = dma.done.wait [#allocation3], 256  }
  0x45   :  { %844 = vsyncadd [#allocation3], 4294967040 }
  0x46   :  { %845 = dma.done.wait [#allocation6], 2048  }
  0x47   :  { %846 = vsyncadd [#allocation6], 4294965248 }
  0x48   :  { %847 = dma.done.wait [#allocation9], 1024  }
  0x49   :  { %848 = vsyncadd [#allocation9], 4294966272  ;;  %v707_v0 = vld [vmem:[#allocation5] sm:$0xff]   ;;  %v708_v1 = vld [vmem:[#allocation5 + $0x8] sm:$0xff]   ;;  %s857_s28 = smov [#allocation10]  }
  0x4a   :  { %618 = vmatprep.subr.bf16.mxu0 %v707_v0  ;;  %v709_v2 = vld [vmem:[#allocation5 + $0x10] sm:$0xff]   ;;  %v710_v3 = vld [vmem:[#allocation5 + $0x18] sm:$0xff]   ;;  %v717_v5 = vld [vmem:[#allocation7] sm:$0xff]   ;;  %s535_s29 = sshll.u32 %s857_s28, 4  ;;  %s536_s29 = int_to_ptr.vmem [resolvable:$true] %s535_s29 }
  0x4b   :  { %619 = vmatpush3.bf16.msra.mxu0 %v707_v0  ;;  %v715_v4 = vld [vmem:[#allocation2] sm:$0xff]   ;;  %v718_v6 = vld [vmem:[#allocation7 + $0x8] sm:$0xff]   ;;  %v711_v7 = vld [vmem:[#allocation5 + $0x20] sm:$0xff]   ;;  %638 = vmatprep.subr.bf16.mxu1 %v717_v5  ;;  %s821_s30 = scalar_lea.vmem %s536_s29, 512  ;;  %p826_p5 = scmp.lt.s32.totalorder %s536_s29, %s536_s29 }
  0x4c   :  { %620 = vmatprep.subr.bf16.mxu0 %v708_v1  ;;  %634 = vmatprep.mubr.bf16.mxu0 %v715_v4  ;;  %v719_v8 = vld [vmem:[#allocation7 + $0x10] sm:$0xff]   ;;  %v712_v9 = vld [vmem:[#allocation5 + $0x28] sm:$0xff]   ;;  %v720_v10 = vld [vmem:[#allocation7 + $0x18] sm:$0xff]   ;;  %p822_p4 = scmp.ne.s32.totalorder %s536_s29, %s821_s30  ;;  %p827_p6 = scmp.lt.s32.totalorder %s821_s30, %s821_s30 }
  0x4d   :  { %639 = vmatpush3.bf16.msra.mxu1 %v717_v5  ;;  %v713_v11 = vld [vmem:[#allocation5 + $0x30] sm:$0xff]   ;;  %v721_v12 = vld [vmem:[#allocation7 + $0x20] sm:$0xff]   ;;  %v714_v13 = vld [vmem:[#allocation5 + $0x38] sm:$0xff]  }
  0x4e   :  { %640 = vmatprep.subr.bf16.mxu1 %v718_v6  ;;  %v722_v14 = vld [vmem:[#allocation7 + $0x28] sm:$0xff]   ;;  %v716_v15 = vld [vmem:[#allocation2 + $0x8] sm:$0xff]   ;;  %v723_v16 = vld [vmem:[#allocation7 + $0x30] sm:$0xff]   ;;  %p828_p7 = por %p827_p6, %p826_p5 }
  0x4f   :  { %621 = vmatpush3.bf16.msra.mxu0 %v708_v1  ;;  %v724_v17 = vld [vmem:[#allocation7 + $0x38] sm:$0xff]   ;;  %v549_v18 = vld [vmem:[%s997_s2] ss:$0 sm:$0xff]  ;;  %v725_v33 = vld [vmem:[#allocation8] sm:$0xff]  }
  0x50   :  { %622 = vmatprep.subr.bf16.mxu0 %v709_v2  ;;  %v726_v34 = vld [vmem:[#allocation8 + $0x8] sm:$0xff]   ;;  %v727_v35 = vld [vmem:[#allocation8 + $0x10] sm:$0xff]   ;;  %v728_v36 = vld [vmem:[#allocation8 + $0x18] sm:$0xff]   ;;  %p829_p8 = pnand %p828_p7, %p822_p4 }
  0x51   :  { %641 = vmatpush3.bf16.msra.mxu1 %v718_v6  ;;  %v729_v37 = vld [vmem:[#allocation8 + $0x20] sm:$0xff]   ;;  %v730_v38 = vld [vmem:[#allocation8 + $0x28] sm:$0xff]   ;;  %v560_v39 = vld [vmem:[%s999_s4] ss:$0 sm:$0xff] }
  0x52   :  { %642 = vmatprep.subr.bf16.mxu1 %v719_v8  ;;  %v731_v54 = vld [vmem:[#allocation8 + $0x30] sm:$0xff]   ;;  %v732_v55 = vld [vmem:[#allocation8 + $0x38] sm:$0xff]  }
  0x53   :  { %623 = vmatpush3.bf16.msra.mxu0 %v709_v2 }
  0x54   :  { %624 = vmatprep.subr.bf16.mxu0 %v710_v3 }
  0x55   :  { %643 = vmatpush3.bf16.msra.mxu1 %v719_v8 }
  0x56   :  { %644 = vmatprep.subr.bf16.mxu1 %v720_v10 }
  0x57   :  { %625 = vmatpush3.bf16.msra.mxu0 %v710_v3 }
  0x58   :  { %626 = vmatprep.subr.bf16.mxu0 %v711_v7 }
  0x59   :  { %645 = vmatpush3.bf16.msra.mxu1 %v720_v10 }
  0x5a   :  { %646 = vmatprep.subr.bf16.mxu1 %v721_v12 }
  0x5b   :  { %627 = vmatpush3.bf16.msra.mxu0 %v711_v7 }
  0x5c   :  { %628 = vmatprep.subr.bf16.mxu0 %v712_v9 }
  0x5d   :  { %647 = vmatpush3.bf16.msra.mxu1 %v721_v12 }
  0x5e   :  { %648 = vmatprep.subr.bf16.mxu1 %v722_v14 }
  0x5f   :  { %629 = vmatpush3.bf16.msra.mxu0 %v712_v9 }
  0x60   :  { %630 = vmatprep.subr.bf16.mxu0 %v713_v11 }
  0x61   :  { %649 = vmatpush3.bf16.msra.mxu1 %v722_v14 }
  0x62   :  { %650 = vmatprep.subr.bf16.mxu1 %v723_v16 }
  0x63   :  { %631 = vmatpush3.bf16.msra.mxu0 %v713_v11 }
  0x64   :  { %632 = vmatprep.subr.bf16.mxu0 %v714_v13 }
  0x65   :  { %651 = vmatpush3.bf16.msra.mxu1 %v723_v16 }
  0x66   :  { %652 = vmatprep.subr.bf16.mxu1 %v724_v17 }
  0x67   :  { %633 = vmatpush3.bf16.msra.mxu0 %v714_v13 }
  0x68   :  { %658 = vmatprep.subr.bf16.mxu0 %v717_v5 }
  0x69   :  { %653 = vmatpush3.bf16.msra.mxu1 %v724_v17 }
  0x6a   :  { %635 = vmatmul.mubr.bf16.vlgmr.msra.gmra.mrb[0].mxu0 %v716_v15  ;;  %678 = vmatprep.subr.bf16.mxu1 %v725_v33 }
  0x6b   :  { %659 = vmatpush3.bf16.msra.mxu0 %v717_v5 }
  0x6c   :  { %660 = vmatprep.subr.bf16.mxu0 %v718_v6 }
  0x6f   :  { %661 = vmatpush3.bf16.msra.mxu0 %v718_v6  ;;  %v569_v6 = vld [vmem:[%s1001_s6] ss:$0 sm:$0xff] }
  0x70   :  { %662 = vmatprep.subr.bf16.mxu0 %v719_v8 }
  0x73   :  { %663 = vmatpush3.bf16.msra.mxu0 %v719_v8 }
  0x74   :  { %664 = vmatprep.subr.bf16.mxu0 %v720_v10 }
  0x77   :  { %665 = vmatpush3.bf16.msra.mxu0 %v720_v10 }
  0x78   :  { %666 = vmatprep.subr.bf16.mxu0 %v721_v12 }
  0x7b   :  { %667 = vmatpush3.bf16.msra.mxu0 %v721_v12 }
  0x7c   :  { %668 = vmatprep.subr.bf16.mxu0 %v722_v14 }
  0x7f   :  { %669 = vmatpush3.bf16.msra.mxu0 %v722_v14 }
  0x80   :  { %670 = vmatprep.subr.bf16.mxu0 %v723_v16 }
  0x83   :  { %671 = vmatpush3.bf16.msra.mxu0 %v723_v16 }
  0x84   :  { %672 = vmatprep.subr.bf16.mxu0 %v724_v17 }
  0x87   :  { %673 = vmatpush3.bf16.msra.mxu0 %v724_v17 }
 0x13d   :  { %v636_v19 = vpop.f32.mrb[0].mxu0 }
 0x13e   :  { %v213_v20 = vadd.f32 %v636_v19, %v549_v18  ;;  %v204_v21 = vpop.f32.mrb[1].mxu0 }
 0x13f   :  { %v205_v22 = vadd.f32 %v549_v18, %v204_v21  ;;  %v637_v23 = vpop.f32.mrb[2].mxu0 }
 0x140   :  { %v216_v24 = vadd.f32 %v637_v23, %v549_v18  ;;  %v207_v25 = vpop.f32.mrb[3].mxu0  ;;  %v221_v27 = vmax.f32 %v213_v20, 0.0 }
 0x141   :  { %v208_v26 = vadd.f32 %v549_v18, %v207_v25  ;;  %v219_v29 = vmax.f32 %v205_v22, 0.0 }
 0x142   :  { %v222_v28 = vmax.f32 %v216_v24, 0.0 }
 0x143   :  { %v220_v30 = vmax.f32 %v208_v26, 0.0 }
 0x144   :  { %v224_v31 = vpack.c.bf16 %v222_v28, %v221_v27 }
 0x145   :  { %v223_v32 = vpack.c.bf16 %v220_v30, %v219_v29 }
 0x147   :  { %654 = vmatprep.mubr.bf16.mxu1 %v223_v32 }
 0x148   :  { %655 = vmatmul.mubr.bf16.vlgmr.msra.gmra.mrb[0].mxu1 %v224_v31 }
 0x149   :  { %679 = vmatpush3.bf16.msra.mxu1 %v725_v33 }
 0x14a   :  { %680 = vmatprep.subr.bf16.mxu1 %v726_v34 }
 0x14d   :  { %681 = vmatpush3.bf16.msra.mxu1 %v726_v34 }
 0x14e   :  { %682 = vmatprep.subr.bf16.mxu1 %v727_v35 }
 0x151   :  { %683 = vmatpush3.bf16.msra.mxu1 %v727_v35 }
 0x152   :  { %684 = vmatprep.subr.bf16.mxu1 %v728_v36 }
 0x155   :  { %685 = vmatpush3.bf16.msra.mxu1 %v728_v36 }
 0x156   :  { %686 = vmatprep.subr.bf16.mxu1 %v729_v37 }
 0x159   :  { %687 = vmatpush3.bf16.msra.mxu1 %v729_v37 }
 0x15a   :  { %688 = vmatprep.subr.bf16.mxu1 %v730_v38 }
 0x15d   :  { %689 = vmatpush3.bf16.msra.mxu1 %v730_v38 }
 0x15e   :  { %690 = vmatprep.subr.bf16.mxu1 %v731_v54 }
 0x161   :  { %691 = vmatpush3.bf16.msra.mxu1 %v731_v54 }
 0x162   :  { %692 = vmatprep.subr.bf16.mxu1 %v732_v55 }
 0x165   :  { %693 = vmatpush3.bf16.msra.mxu1 %v732_v55 }
 0x21b   :  { %v656_v40 = vpop.f32.mrb[0].mxu1 }
 0x21c   :  { %v339_v41 = vadd.f32 %v656_v40, %v560_v39  ;;  %v330_v42 = vpop.f32.mrb[1].mxu1 }
 0x21d   :  { %v331_v43 = vadd.f32 %v560_v39, %v330_v42  ;;  %v657_v44 = vpop.f32.mrb[2].mxu1 }
 0x21e   :  { %v342_v45 = vadd.f32 %v657_v44, %v560_v39  ;;  %v333_v46 = vpop.f32.mrb[3].mxu1  ;;  %v347_v48 = vmax.f32 %v339_v41, 0.0 }
 0x21f   :  { %v334_v47 = vadd.f32 %v560_v39, %v333_v46  ;;  %v345_v50 = vmax.f32 %v331_v43, 0.0 }
 0x220   :  { %v348_v49 = vmax.f32 %v342_v45, 0.0 }
 0x221   :  { %v346_v51 = vmax.f32 %v334_v47, 0.0 }
 0x222   :  { %v350_v52 = vpack.c.bf16 %v348_v49, %v347_v48 }
 0x223   :  { %v349_v53 = vpack.c.bf16 %v346_v51, %v345_v50 }
 0x225   :  { %674 = vmatprep.mubr.bf16.mxu0 %v349_v53 }
 0x226   :  { %675 = vmatmul.mubr.bf16.vlgmr.msra.gmra.mrb[4].mxu0 %v350_v52 }
 0x2f9   :  { %v676_v56 = vpop.f32.mrb[4].mxu0 }
 0x2fa   :  { %v394_v57 = vadd.f32 %v676_v56, %v560_v39  ;;  %v385_v58 = vpop.f32.mrb[5].mxu0 }
 0x2fb   :  { %v386_v59 = vadd.f32 %v560_v39, %v385_v58  ;;  %v677_v60 = vpop.f32.mrb[6].mxu0 }
 0x2fc   :  { %v397_v61 = vadd.f32 %v677_v60, %v560_v39  ;;  %v388_v62 = vpop.f32.mrb[7].mxu0  ;;  %v402_v0 = vmax.f32 %v394_v57, 0.0 }
 0x2fd   :  { %v389_v63 = vadd.f32 %v560_v39, %v388_v62  ;;  %v400_v2 = vmax.f32 %v386_v59, 0.0 }
 0x2fe   :  { %v403_v1 = vmax.f32 %v397_v61, 0.0 }
 0x2ff   :  { %v401_v3 = vmax.f32 %v389_v63, 0.0 }
 0x300   :  { %v405_v4 = vpack.c.bf16 %v403_v1, %v402_v0 }
 0x301   :  { %v404_v5 = vpack.c.bf16 %v401_v3, %v400_v2 }
 0x303   :  { %694 = vmatprep.mubr.bf16.mxu1 %v404_v5 }
 0x304   :  { %695 = vmatmul.mubr.bf16.vlgmr.msra.gmra.mrb[4].mxu1 %v405_v4 }
 0x3d7   :  { %v696_v7 = vpop.f32.mrb[4].mxu1 }
 0x3d8   :  { %v520_v8 = vadd.f32 %v696_v7, %v569_v6  ;;  %v511_v9 = vpop.f32.mrb[5].mxu1 }
 0x3d9   :  { %v512_v10 = vadd.f32 %v569_v6, %v511_v9  ;;  %v697_v11 = vpop.f32.mrb[6].mxu1 }
 0x3da   :  { %528 = vst [vmem:[#allocation10 + $0x10] sm:$0xff] %v520_v8  ;;  %v523_v12 = vadd.f32 %v697_v11, %v569_v6  ;;  %v514_v13 = vpop.f32.mrb[7].mxu1 }
 0x3db   :  { %526 = vst [vmem:[#allocation10] sm:$0xff] %v512_v10  ;;  %v515_v14 = vadd.f32 %v569_v6, %v514_v13 }
 0x3dc   :  { %529 = vst [vmem:[#allocation10 + $0x18] sm:$0xff] %v523_v12 }
 0x3dd   :  { %527 = vst [vmem:[#allocation10 + $0x8] sm:$0xff] %v515_v14 }
 0x3de   :  { %832 = shalt.err (!%p829_p8)
}
 0x3df   :  { %s833_s9 = scalar_lea.hbm %s1002_s7, 512 }
 0x3e0   :  { %p834_p9 = scmp.ne.s32.totalorder %s1002_s7, %s833_s9  ;;  %p837_p10 = scmp.lt.u32.totalorder %s833_s9, %s1002_s7 }
 0x3e2   :  { %p839_p11 = pnand %p837_p10, %p834_p9 }
 0x3e4   :  { %842 = shalt.err (!%p839_p11)
}
 0x3e5   :  { %s858_s16 = smov 128   ;;  %s859_s0 = smov 8  }
 0x3e6   :  { %541 = dma.vmem_to_hbm [thread:$0]  %s536_s29, 512, %s1002_s7, [#allocation4], %s858_s16, %s858_s16, %s859_s0  }
 0x3e7   :  { %849 = dma.done.wait [#allocation4], 512  }
 0x3e8   :  { %850 = vsyncadd [#allocation4], 4294966784 }
 0x3e9   :  { %545 = vsyncpa [#allocation3], 1 }
 0x3ea   :  { %546 = vsyncpa [#allocation6], 1 }
 0x3eb   :  { %547 = vsyncpa [#allocation9], 1 }
 0x3ec   :  { %548 = vsyncpa [#allocation4], 1 }

</bundles_post_ra>
